<compile_context>
chip_gen: v7x
topology: tpu7x:2x2x1
jax: 0.10.0
libtpu: 0.0.40
codegen_flags: <defaults>
</compile_context>

<pallas_src>
import jax
import jax.numpy as jnp
from jax.experimental import pallas as pl
from jax.experimental.pallas import tpu as pltpu


def _round_up(x, m):
    return ((x + m - 1) // m) * m


def _critic_kernel(state_ref, action_ref,
                   bn_scale_ref, bn_shift_ref,
                   w1_ref, b1_ref,
                   w2s_ref, w2a_ref, b2_ref,
                   w3_row_ref, b3_ref,
                   out_ref):
    mxu_dt = w1_ref.dtype  # weights pre-cast in the wrapper (f32 or bf16)

    # --- BatchNorm1d folded to affine (stats precomputed over full batch) ---
    s = state_ref[...].astype(jnp.float32)                       # (TB, S)
    s_hat = s * bn_scale_ref[...] + bn_shift_ref[...]

    # --- fcs1 + ReLU (MXU; f32 accumulation) ---
    xs = jnp.dot(s_hat.astype(mxu_dt), w1_ref[...],
                 preferred_element_type=jnp.float32)
    xs = jnp.maximum(xs + b1_ref[...], 0.0)                      # (TB, F1)

    # --- fc2 on concat([xs, action]) == xs @ W2s + action @ W2a ---
    h = jnp.dot(xs.astype(mxu_dt), w2s_ref[...],
                preferred_element_type=jnp.float32)               # (TB, F2)
    # K = action_size (tiny) contraction: broadcast FMAs on the VPU instead of
    # a near-empty MXU matmul.  Static unrolled loop (A is small & fixed).
    a = action_ref[...].astype(jnp.float32)                      # (TB, A)
    w2a = w2a_ref[...]                                           # (A, F2) f32
    for k in range(w2a.shape[0]):
        h = h + a[:, k:k + 1] * w2a[k:k + 1, :]
    h = jnp.maximum(h + b2_ref[...], 0.0)                        # (TB, F2)

    # --- fc3 (out_features=1): elementwise mul + lane reduce (XLU), then one
    # small (TB,1)->(1,TB) transpose so the output store is lane-dense. ---
    q = jnp.sum(h * w3_row_ref[...], axis=-1, keepdims=True)     # (TB, 1)
    q = q + b3_ref[0, 0]                                         # SMEM scalar
    out_ref[...] = jnp.transpose(q).astype(out_ref.dtype)        # (1, TB)


def critic_forward(state, action, params, *, eps=1e-5, batch_tile=1024,
                   matmul_dtype=jnp.bfloat16):
    """Pallas wrapper. state: (B, S), action: (B, A) -> (B, 1) f32 Q-values."""
    B, S = state.shape
    A = action.shape[1]
    F1 = params["w1"].shape[1]
    F2 = params["w2s"].shape[1]

    # BatchNorm1d training-mode statistics over the FULL batch, computed once
    # here (outside the tiled kernel) so the batch grid axis can be "parallel"
    # without changing semantics.  Reductions run in f32, but the kernel
    # consumes the caller's native dtype (no materialized f32 copy is fed in).
    s32 = state.astype(jnp.float32)
    mean = jnp.mean(s32, axis=0, keepdims=True)
    var = jnp.mean(jnp.square(s32 - mean), axis=0, keepdims=True)  # biased
    gamma = params["gamma"].astype(jnp.float32)
    beta = params["beta"].astype(jnp.float32)
    bn_scale = gamma * jax.lax.rsqrt(var + eps)                    # (1, S)
    bn_shift = beta - mean * bn_scale                              # (1, S)

    # Pre-cast only the MXU weight operands once (halves their DMA/VMEM bytes
    # for bf16 and removes per-tile VPU casts).  Tiny VPU tensors stay f32.
    w1 = params["w1"].astype(matmul_dtype)                         # (S, F1)
    w2s = params["w2s"].astype(matmul_dtype)                       # (F1, F2)
    w2a = params["w2a"].astype(jnp.float32)                        # (A, F2)
    b1 = params["b1"].astype(jnp.float32)                          # (1, F1)
    b2 = params["b2"].astype(jnp.float32)                          # (1, F2)
    w3_row = params["w3"].astype(jnp.float32).T                    # (1, F2)
    b3 = params["b3"].astype(jnp.float32).reshape(1, 1)            # (1, 1)

    # Pad only to a multiple of 8 sublanes (cheap, at most 7 rows); ragged
    # trailing batch tiles are handled by the pl.cdiv grid (rows are
    # independent, padded/garbage rows are sliced/masked away).
    B8 = _round_up(B, 8)
    if B8 != B:
        state = jnp.pad(state, ((0, B8 - B), (0, 0)))
        action = jnp.pad(action, ((0, B8 - B), (0, 0)))

    if B8 <= 256:
        TB = B8                          # single tile; block dims == array dims
    else:
        # Lane-aligned (multiple of 128) tile, capped so the grid has at least
        # two tiles: lets the "parallel" batch axis shard across v7x's 2 TCs.
        TB = min(max(_round_up(batch_tile, 128), 128),
                 _round_up(pl.cdiv(B8, 2), 128))
    grid_b = pl.cdiv(B8, TB)

    row_spec = lambda c: pl.BlockSpec((TB, c), lambda i: (i, 0))      # tiled
    rep_spec = lambda r, c: pl.BlockSpec((r, c), lambda i: (0, 0))    # replicated

    in_isz = jnp.dtype(state.dtype).itemsize
    w_isz = jnp.dtype(matmul_dtype).itemsize
    flops = 2 * B8 * (S * F1 + F1 * F2 + A * F2 + F2) + 2 * B8 * S
    bytes_accessed = int(
        in_isz * B8 * (S + A)                       # state, action
        + 4 * B8                                    # q output
        + 4 * (2 * S + F1 + A * F2 + F2 + F2 + 1)   # bn, b1, w2a, b2, w3, b3
        + w_isz * (S * F1 + F1 * F2))               # w1, w2s

    out = pl.pallas_call(
        _critic_kernel,
        out_shape=jax.ShapeDtypeStruct((1, B8), jnp.float32),
        grid=(grid_b,),
        in_specs=[
            row_spec(S),            # state tile
            row_spec(A),            # action tile
            rep_spec(1, S),         # bn_scale
            rep_spec(1, S),         # bn_shift
            rep_spec(S, F1),        # w1
            rep_spec(1, F1),        # b1
            rep_spec(F1, F2),       # w2s
            rep_spec(A, F2),        # w2a
            rep_spec(1, F2),        # b2
            rep_spec(1, F2),        # w3_row
            pl.BlockSpec(memory_space=pltpu.MemorySpace.SMEM),  # b3 scalar
        ],
        out_specs=pl.BlockSpec((1, TB), lambda i: (0, i)),      # lane-dense
        compiler_params=pltpu.CompilerParams(
            dimension_semantics=("parallel",)),
        cost_estimate=pl.CostEstimate(
            flops=flops, transcendentals=0, bytes_accessed=bytes_accessed),
    )(state, action, bn_scale, bn_shift, w1, b1, w2s, w2a, b2, w3_row, b3)

    return out[0, :B].reshape(B, 1)


def init_params(key, state_size, action_size, fcs1_units, fc2_units):
    """Deterministic init mirroring the PyTorch module's reset_parameters."""
    ks = jax.random.split(key, 6)
    # hidden_init uses fan_in = weight.size(0) = out_features in the original
    # code; reproduce that convention.
    lim1 = 1.0 / jnp.sqrt(jnp.float32(fcs1_units))
    lim2 = 1.0 / jnp.sqrt(jnp.float32(fc2_units))

    w1 = jax.random.uniform(ks[0], (state_size, fcs1_units),
                            minval=-lim1, maxval=lim1, dtype=jnp.float32)
    b1 = jax.random.uniform(ks[1], (1, fcs1_units),
                            minval=-lim1, maxval=lim1, dtype=jnp.float32)

    w2_full = jax.random.uniform(ks[2], (fcs1_units + action_size, fc2_units),
                                 minval=-lim2, maxval=lim2, dtype=jnp.float32)
    b2 = jax.random.uniform(ks[3], (1, fc2_units),
                            minval=-lim2, maxval=lim2, dtype=jnp.float32)

    w3 = jax.random.uniform(ks[4], (fc2_units, 1),
                            minval=-0.003, maxval=0.003, dtype=jnp.float32)
    b3 = jax.random.uniform(ks[5], (1, 1),
                            minval=-0.003, maxval=0.003, dtype=jnp.float32)

    return {
        "gamma": jnp.ones((1, state_size), jnp.float32),   # BatchNorm1d weight
        "beta": jnp.zeros((1, state_size), jnp.float32),   # BatchNorm1d bias
        "w1": w1, "b1": b1,
        "w2s": w2_full[:fcs1_units, :],                    # state-branch half
        "w2a": w2_full[fcs1_units:, :],                    # action-branch half
        "b2": b2,
        "w3": w3, "b3": b3,
    }


def critic_reference(state, action, params, *, eps=1e-5):
    """Pure-JAX reference for correctness check."""
    s = state.astype(jnp.float32)
    mean = jnp.mean(s, axis=0, keepdims=True)
    var = jnp.mean((s - mean) ** 2, axis=0, keepdims=True)
    s_hat = (s - mean) / jnp.sqrt(var + eps) * params["gamma"] + params["beta"]
    xs = jax.nn.relu(s_hat @ params["w1"] + params["b1"])
    x = jnp.concatenate([xs, action.astype(jnp.float32)], axis=1)
    w2 = jnp.concatenate([params["w2s"], params["w2a"]], axis=0)
    h = jax.nn.relu(x @ w2 + params["b2"])
    return h @ params["w3"] + params["b3"]


if __name__ == "__main__":
    # Small Tennis-like shapes.
    batch = 8
    state_size = 24
    action_size = 2
    fcs1_units = 64
    fc2_units = 32

    key = jax.random.PRNGKey(0)
    k_state, k_action, k_params, k_s2, k_a2 = jax.random.split(key, 5)

    state = jax.random.normal(k_state, (batch, state_size), dtype=jnp.float32)
    action = jax.random.uniform(k_action, (batch, action_size),
                                minval=-1.0, maxval=1.0, dtype=jnp.float32)
    params = init_params(k_params, state_size, action_size,
                         fcs1_units, fc2_units)

    q_ref = critic_reference(state, action, params)

    # f32 MXU path (exact within tight tolerance).
    q = jax.block_until_ready(
        critic_forward(state, action, params, matmul_dtype=jnp.float32))
    assert q.shape == (batch, 1)
    assert jnp.allclose(q, q_ref, atol=1e-5, rtol=1e-5)

    # Default bf16 MXU-input path (f32 accumulation); looser tolerance.
    q_bf16 = jax.block_until_ready(critic_forward(state, action, params))
    assert q_bf16.shape == (batch, 1)
    assert jnp.allclose(q_bf16, q_ref, atol=5e-2, rtol=5e-2)

    # Larger, ragged batch: exercises the multi-tile "parallel" grid, the
    # pl.cdiv partial trailing block, and the minimal 8-row padding path.
    batch2 = 300
    state2 = jax.random.normal(k_s2, (batch2, state_size), dtype=jnp.float32)
    action2 = jax.random.uniform(k_a2, (batch2, action_size),
                                 minval=-1.0, maxval=1.0, dtype=jnp.float32)
    q2_ref = critic_reference(state2, action2, params)
    q2 = jax.block_until_ready(critic_forward(state2, action2, params))
    assert q2.shape == (batch2, 1)
    assert jnp.allclose(q2, q2_ref, atol=5e-2, rtol=5e-2)

    print("KERNEL_OK")
</pallas_src>

<mosaic_0001>
module attributes {stable_mosaic.version = 11 : i64} {
  func.func @_critic_kernel(%arg0: i32, %arg1: memref<8x24xf32, #tpu.memory_space<vmem>>, %arg2: memref<8x2xf32, #tpu.memory_space<vmem>>, %arg3: memref<1x24xf32, #tpu.memory_space<vmem>>, %arg4: memref<1x24xf32, #tpu.memory_space<vmem>>, %arg5: memref<24x64xf32, #tpu.memory_space<vmem>>, %arg6: memref<1x64xf32, #tpu.memory_space<vmem>>, %arg7: memref<64x32xf32, #tpu.memory_space<vmem>>, %arg8: memref<2x32xf32, #tpu.memory_space<vmem>>, %arg9: memref<1x32xf32, #tpu.memory_space<vmem>>, %arg10: memref<1x32xf32, #tpu.memory_space<vmem>>, %arg11: memref<1x1xf32, #tpu.memory_space<smem>>, %arg12: memref<1x8xf32, #tpu.memory_space<vmem>>) attributes {dimension_semantics = [#tpu.dimension_semantics<parallel>], iteration_bounds = array<i64: 1>, scalar_prefetch = 0 : i64, scratch_operands = 0 : i64, tpu.core_type = #tpu.core_type<tc>, window_params = [{transform_indices = @transform_0, window_bounds = array<i64: 8, 24>}, {transform_indices = @transform_1, window_bounds = array<i64: 8, 2>}, {pipeline_mode = #tpu.pipeline_mode<synchronous>, transform_indices = @transform_2, window_bounds = array<i64: 1, 24>}, {pipeline_mode = #tpu.pipeline_mode<synchronous>, transform_indices = @transform_3, window_bounds = array<i64: 1, 24>}, {pipeline_mode = #tpu.pipeline_mode<synchronous>, transform_indices = @transform_4, window_bounds = array<i64: 24, 64>}, {pipeline_mode = #tpu.pipeline_mode<synchronous>, transform_indices = @transform_5, window_bounds = array<i64: 1, 64>}, {pipeline_mode = #tpu.pipeline_mode<synchronous>, transform_indices = @transform_6, window_bounds = array<i64: 64, 32>}, {pipeline_mode = #tpu.pipeline_mode<synchronous>, transform_indices = @transform_7, window_bounds = array<i64: 2, 32>}, {pipeline_mode = #tpu.pipeline_mode<synchronous>, transform_indices = @transform_8, window_bounds = array<i64: 1, 32>}, {pipeline_mode = #tpu.pipeline_mode<synchronous>, transform_indices = @transform_9, window_bounds = array<i64: 1, 32>}, {transform_indices = @transform_10, window_bounds = array<i64: 1, 1>}, {transform_indices = @transform_11, window_bounds = array<i64: 1, 8>}]} {
    %c0 = arith.constant 0 : index
    %c0_0 = arith.constant 0 : index
    %0 = vector.load %arg1[%c0, %c0_0] : memref<8x24xf32, #tpu.memory_space<vmem>>, vector<8x24xf32>
    %c0_1 = arith.constant 0 : index
    %c0_2 = arith.constant 0 : index
    %1 = vector.load %arg3[%c0_1, %c0_2] : memref<1x24xf32, #tpu.memory_space<vmem>>, vector<1x24xf32>
    %2 = vector.broadcast %1 : vector<1x24xf32> to vector<8x24xf32>
    %3 = arith.mulf %0, %2 : vector<8x24xf32>
    %c0_3 = arith.constant 0 : index
    %c0_4 = arith.constant 0 : index
    %4 = vector.load %arg4[%c0_3, %c0_4] : memref<1x24xf32, #tpu.memory_space<vmem>>, vector<1x24xf32>
    %5 = vector.broadcast %4 : vector<1x24xf32> to vector<8x24xf32>
    %6 = arith.addf %3, %5 : vector<8x24xf32>
    %c0_5 = arith.constant 0 : index
    %c0_6 = arith.constant 0 : index
    %7 = vector.load %arg5[%c0_5, %c0_6] : memref<24x64xf32, #tpu.memory_space<vmem>>, vector<24x64xf32>
    %cst = arith.constant dense<0.000000e+00> : vector<8x64xf32>
    %8 = tpu.matmul %6, %7, %cst {dimension_numbers = #tpu.dot_dimension_numbers<[1], [0], [0], [1], [0, 0, 1, 1], [], []>} : vector<8x24xf32>, vector<24x64xf32>, vector<8x64xf32> -> vector<8x64xf32>
    %c0_7 = arith.constant 0 : index
    %c0_8 = arith.constant 0 : index
    %9 = vector.load %arg6[%c0_7, %c0_8] : memref<1x64xf32, #tpu.memory_space<vmem>>, vector<1x64xf32>
    %10 = vector.broadcast %9 : vector<1x64xf32> to vector<8x64xf32>
    %11 = arith.addf %8, %10 : vector<8x64xf32>
    %cst_9 = arith.constant 0.000000e+00 : f32
    %12 = vector.broadcast %cst_9 : f32 to vector<8x64xf32>
    %13 = arith.maximumf %11, %12 : vector<8x64xf32>
    %c0_10 = arith.constant 0 : index
    %c0_11 = arith.constant 0 : index
    %14 = vector.load %arg7[%c0_10, %c0_11] : memref<64x32xf32, #tpu.memory_space<vmem>>, vector<64x32xf32>
    %cst_12 = arith.constant dense<0.000000e+00> : vector<8x32xf32>
    %15 = tpu.matmul %13, %14, %cst_12 {dimension_numbers = #tpu.dot_dimension_numbers<[1], [0], [0], [1], [0, 0, 1, 1], [], []>} : vector<8x64xf32>, vector<64x32xf32>, vector<8x32xf32> -> vector<8x32xf32>
    %c0_13 = arith.constant 0 : index
    %c0_14 = arith.constant 0 : index
    %16 = vector.load %arg2[%c0_13, %c0_14] : memref<8x2xf32, #tpu.memory_space<vmem>>, vector<8x2xf32>
    %c0_15 = arith.constant 0 : index
    %c0_16 = arith.constant 0 : index
    %17 = vector.load %arg8[%c0_15, %c0_16] : memref<2x32xf32, #tpu.memory_space<vmem>>, vector<2x32xf32>
    %18 = vector.extract_strided_slice %16 {offsets = [0, 0], sizes = [8, 1], strides = [1, 1]} : vector<8x2xf32> to vector<8x1xf32>
    %19 = vector.extract_strided_slice %17 {offsets = [0, 0], sizes = [1, 32], strides = [1, 1]} : vector<2x32xf32> to vector<1x32xf32>
    %20 = vector.broadcast %18 : vector<8x1xf32> to vector<8x32xf32>
    %21 = vector.broadcast %19 : vector<1x32xf32> to vector<8x32xf32>
    %22 = arith.mulf %20, %21 : vector<8x32xf32>
    %23 = arith.addf %15, %22 : vector<8x32xf32>
    %24 = vector.extract_strided_slice %16 {offsets = [0, 1], sizes = [8, 1], strides = [1, 1]} : vector<8x2xf32> to vector<8x1xf32>
    %25 = vector.extract_strided_slice %17 {offsets = [1, 0], sizes = [1, 32], strides = [1, 1]} : vector<2x32xf32> to vector<1x32xf32>
    %26 = vector.broadcast %24 : vector<8x1xf32> to vector<8x32xf32>
    %27 = vector.broadcast %25 : vector<1x32xf32> to vector<8x32xf32>
    %28 = arith.mulf %26, %27 : vector<8x32xf32>
    %29 = arith.addf %23, %28 : vector<8x32xf32>
    %c0_17 = arith.constant 0 : index
    %c0_18 = arith.constant 0 : index
    %30 = vector.load %arg9[%c0_17, %c0_18] : memref<1x32xf32, #tpu.memory_space<vmem>>, vector<1x32xf32>
    %31 = vector.broadcast %30 : vector<1x32xf32> to vector<8x32xf32>
    %32 = arith.addf %29, %31 : vector<8x32xf32>
    %cst_19 = arith.constant 0.000000e+00 : f32
    %33 = vector.broadcast %cst_19 : f32 to vector<8x32xf32>
    %34 = arith.maximumf %32, %33 : vector<8x32xf32>
    %c0_20 = arith.constant 0 : index
    %c0_21 = arith.constant 0 : index
    %35 = vector.load %arg10[%c0_20, %c0_21] : memref<1x32xf32, #tpu.memory_space<vmem>>, vector<1x32xf32>
    %36 = vector.broadcast %35 : vector<1x32xf32> to vector<8x32xf32>
    %37 = arith.mulf %34, %36 : vector<8x32xf32>
    %cst_22 = arith.constant dense<0.000000e+00> : vector<8xf32>
    %38 = vector.multi_reduction <add>, %37, %cst_22 [1] : vector<8x32xf32> to vector<8xf32>
    %39 = vector.shape_cast %38 : vector<8xf32> to vector<8x1xf32>
    %c0_23 = arith.constant 0 : index
    %c0_24 = arith.constant 0 : index
    %40 = memref.load %arg11[%c0_23, %c0_24] : memref<1x1xf32, #tpu.memory_space<smem>>
    %41 = vector.broadcast %40 : f32 to vector<8x1xf32>
    %42 = arith.addf %39, %41 : vector<8x1xf32>
    %43 = tpu.transpose %42, [1, 0] : vector<8x1xf32> -> vector<1x8xf32>
    %c0_25 = arith.constant 0 : index
    %c0_26 = arith.constant 0 : index
    %44 = vector.load %arg12[%c0_25, %c0_26] : memref<1x8xf32, #tpu.memory_space<vmem>>, vector<1x8xf32>
    tpu.vector_store %arg12[%c0_25, %c0_26], %43 {strides = array<i32>} : memref<1x8xf32, #tpu.memory_space<vmem>>, vector<1x8xf32>,
    return
  }
  func.func @transform_0(%arg0: i32) -> (i32, i32) {
    %c0_i32 = arith.constant 0 : i32
    %c0_i32_0 = arith.constant 0 : i32
    return %arg0, %c0_i32 : i32, i32
  }
  func.func @transform_1(%arg0: i32) -> (i32, i32) {
    %c0_i32 = arith.constant 0 : i32
    %c0_i32_0 = arith.constant 0 : i32
    return %arg0, %c0_i32 : i32, i32
  }
  func.func @transform_2(%arg0: i32) -> (i32, i32) {
    %c0_i32 = arith.constant 0 : i32
    %c0_i32_0 = arith.constant 0 : i32
    %c0_i32_1 = arith.constant 0 : i32
    return %c0_i32, %c0_i32_0 : i32, i32
  }
  func.func @transform_3(%arg0: i32) -> (i32, i32) {
    %c0_i32 = arith.constant 0 : i32
    %c0_i32_0 = arith.constant 0 : i32
    %c0_i32_1 = arith.constant 0 : i32
    return %c0_i32, %c0_i32_0 : i32, i32
  }
  func.func @transform_4(%arg0: i32) -> (i32, i32) {
    %c0_i32 = arith.constant 0 : i32
    %c0_i32_0 = arith.constant 0 : i32
    %c0_i32_1 = arith.constant 0 : i32
    return %c0_i32, %c0_i32_0 : i32, i32
  }
  func.func @transform_5(%arg0: i32) -> (i32, i32) {
    %c0_i32 = arith.constant 0 : i32
    %c0_i32_0 = arith.constant 0 : i32
    %c0_i32_1 = arith.constant 0 : i32
    return %c0_i32, %c0_i32_0 : i32, i32
  }
  func.func @transform_6(%arg0: i32) -> (i32, i32) {
    %c0_i32 = arith.constant 0 : i32
    %c0_i32_0 = arith.constant 0 : i32
    %c0_i32_1 = arith.constant 0 : i32
    return %c0_i32, %c0_i32_0 : i32, i32
  }
  func.func @transform_7(%arg0: i32) -> (i32, i32) {
    %c0_i32 = arith.constant 0 : i32
    %c0_i32_0 = arith.constant 0 : i32
    %c0_i32_1 = arith.constant 0 : i32
    return %c0_i32, %c0_i32_0 : i32, i32
  }
  func.func @transform_8(%arg0: i32) -> (i32, i32) {
    %c0_i32 = arith.constant 0 : i32
    %c0_i32_0 = arith.constant 0 : i32
    %c0_i32_1 = arith.constant 0 : i32
    return %c0_i32, %c0_i32_0 : i32, i32
  }
  func.func @transform_9(%arg0: i32) -> (i32, i32) {
    %c0_i32 = arith.constant 0 : i32
    %c0_i32_0 = arith.constant 0 : i32
    %c0_i32_1 = arith.constant 0 : i32
    return %c0_i32, %c0_i32_0 : i32, i32
  }
  func.func @transform_10(%arg0: i32) -> (i32, i32) {
    %c0_i32 = arith.constant 0 : i32
    %c0_i32_0 = arith.constant 0 : i32
    %c0_i32_1 = arith.constant 0 : i32
    return %c0_i32, %c0_i32_0 : i32, i32
  }
  func.func @transform_11(%arg0: i32) -> (i32, i32) {
    %c0_i32 = arith.constant 0 : i32
    %c0_i32_0 = arith.constant 0 : i32
    return %c0_i32, %arg0 : i32, i32
  }
}

</mosaic_0001>

<bundles_post_ra>
// kernel: tpu_custom_call.1
= control target key start
LH: loop header
LB: loop body
LE: loop exit
PB: predicated region body
PF: predicated region fallthrough
CT: control target
= control target key end

     0   :  { %v413_v2 = vmov 0.0|0.0   ;;  %vm414_vm0 = vmmov 0   ;;  %v415_v4 = vmov 0.0   ;;  %s551_s0 = inlined_call_operand.vmem [shape: f32[8,24], index: 0, kind: input, shape index: {}]   ;;  %s552_s1 = inlined_call_operand.vmem [shape: f32[8,2], index: 1, kind: input, shape index: {}]   ;;  %s553_s2 = inlined_call_operand.vmem [shape: f32[1,24], index: 2, kind: input, shape index: {}]   ;;  %s554_s3 = inlined_call_operand.vmem [shape: f32[1,24], index: 3, kind: input, shape index: {}]   ;;  %s555_s4 = inlined_call_operand.vmem [shape: f32[24,64], index: 4, kind: input, shape index: {}]   ;;  %s556_s5 = inlined_call_operand.vmem [shape: f32[1,64], index: 5, kind: input, shape index: {}]   ;;  %s557_s6 = inlined_call_operand.vmem [shape: f32[64,32], index: 6, kind: input, shape index: {}]   ;;  %s558_s7 = inlined_call_operand.vmem [shape: f32[2,32], index: 7, kind: input, shape index: {}]   ;;  %s559_s8 = inlined_call_operand.vmem [shape: f32[1,32], index: 8, kind: input, shape index: {}]   ;;  %s560_s9 = inlined_call_operand.vmem [shape: f32[1,32], index: 9, kind: input, shape index: {}]   ;;  %s561_s10 = inlined_call_operand.<no memory space> [shape: f32[1,1], index: 10, kind: input, shape index: {}]   ;;  %s562_s11 = inlined_call_operand.hbm [shape: f32[1,8], index: 11, kind: output, shape index: {}]  }
   0x1   :  { %v57_v0 = vld [vmem:[%s555_s4] sm:$0xff]  ;;  %v58_v1 = vld [vmem:[%s555_s4 + $0x8] sm:$0xff]  ;;  %366 = vmatprep.subr.bf16.mxu0 %v413_v2  ;;  %344 = vmatprep.mubr.msk.f32.mxu0 %vm414_vm0, %v415_v4  ;;  %v144_v11 = vld [vmem:[%s557_s6 + $0x10] sm:$0xff] }
   0x2   :  { %v367_v3 = vpack.c.bf16 %v58_v1, %v57_v0  ;;  %v40_v5 = vld [vmem:[%s551_s0] sm:$0xff]  ;;  %369 = vmatprep.subr.bf16.mxu1 %v413_v2  ;;  %v143_v10 = vld [vmem:[%s557_s6 + $0x8] sm:$0xff]  ;;  %363 = vmatprep.mubr.msk.f32.mxu1 %vm414_vm0, %v415_v4  ;;  %v145_v13 = vld [vmem:[%s557_s6 + $0x18] sm:$0xff] }
   0x3   :  { %v318_v6 = vld [vmem:[%s553_s2] ss:$0 sm:$0xff]  ;;  %v59_v14 = vld [vmem:[%s555_s4 + $0x10] sm:$0xff] }
   0x4   :  { %v319_v7 = vld [vmem:[%s554_s3] ss:$0 sm:$0xff]  ;;  %v48_v8 = vmul.f32 %v318_v6, %v40_v5  ;;  %368 = vmatpush3.bf16.msra.mxu0 %v367_v3 }
   0x5   :  { %v142_v9 = vld [vmem:[%s557_s6] sm:$0xff]  ;;  %342 = vmatprep.subr.mxu0 %v415_v4 }
   0x6   :  { %v370_v12 = vpack.c.bf16 %v143_v10, %v142_v9  ;;  %v56_v15 = vadd.f32 %v319_v7, %v48_v8 }
   0x7   :  { %17 = vsyncpa [#allocation4], 0  ;;  %vm67_vm1 = vcmask 195584   ;;  %v373_v16 = vpack.c.bf16 %v145_v13, %v144_v11  ;;  %v146_v17 = vld [vmem:[%s557_s6 + $0x20] sm:$0xff]  ;;  %v147_v18 = vld [vmem:[%s557_s6 + $0x28] sm:$0xff]  ;;  %v416_v24 = vmov 0   ;;  %v157_v31 = vlaneseq }
   0x8   :  { %371 = vmatpush3.bf16.msra.mxu1 %v370_v12  ;;  %343 = vmatpush3.msra.mxu0 %v59_v14  ;;  %v376_v19 = vpack.c.bf16 %v147_v18, %v146_v17  ;;  %v148_v20 = vld [vmem:[%s557_s6 + $0x30] sm:$0xff]  ;;  %v149_v21 = vld [vmem:[%s557_s6 + $0x38] sm:$0xff]  ;;  %v150_v23 = vld [vmem:[%s552_s1] sm:$0xff]  ;;  %v417_v25 = vmov 1   ;;  %vm162_vm2 = vcmask 523264   ;;  %vm263_vm3 = vcmask 261120  }
   0x9   :  { %372 = vmatprep.subr.bf16.mxu1 %v413_v2  ;;  %345 = vmatmul.mubr.msk.f32.vlgmr.msra.gmra.mrb[0].mxu0 %vm67_vm1, %v56_v15  ;;  %v379_v22 = vpack.c.bf16 %v149_v21, %v148_v20  ;;  %v320_v26 = vld [vmem:[%s556_s5] ss:$0 sm:$0xff]  ;;  %v158_v32 = vshrl.u32 %v157_v31, 7  ;;  %v268_v52 = vstv %s561_s10  ;;  %s418_s30 = smov [#allocation3]   ;;  %vm302_vm4 = vcmask 57344  }
   0xa   :  { %387 = vset.pattern.permute.xlu0 %v416_v24  ;;  %v151_v36 = vld [vmem:[%s558_s7] sm:$0x3] }
   0xb   :  { %154 = vperm.xlu0 %387, %v150_v23   ;;  %v159_v34 = vsub.s32 0, %v158_v32  ;;  %v242_v35 = vsub.s32 1, %v158_v32  ;;  %v323_v45 = vld [vmem:[%s559_s8] ss:$0 sm:$0xff]  ;;  %s310_s8 = sshll.u32 %s418_s30, 4  ;;  %s311_s8 = int_to_ptr.vmem [resolvable:$true] %s310_s8 }
   0xc   :  { %374 = vmatpush3.bf16.msra.mxu1 %v373_v16  ;;  %v324_v48 = vld [vmem:[%s560_s9] ss:$0 sm:$0xff]  ;;  %s389_s12 = scalar_lea.vmem %s311_s8, 16  ;;  %s393_s9 = scalar_lea.vmem %s311_s8, 32 }
   0xd   :  { %375 = vmatprep.subr.bf16.mxu1 %v413_v2  ;;  %v160_v37 = vrot.slane %v151_v36, %v159_v34  ;;  %v243_v38 = vrot.slane %v151_v36, %v242_v35  ;;  %p390_p0 = scmp.ne.s32.totalorder %s311_s8, %s389_s12  ;;  %p394_p1 = scmp.lt.s32.totalorder %s311_s8, %s311_s8 }
   0xe   :  { %p395_p2 = scmp.lt.s32.totalorder %s393_s9, %s389_s12 }
   0xf   :  { %388 = vset.pattern.permute.xlu0 %v417_v25 }
  0x10   :  { %377 = vmatpush3.bf16.msra.mxu1 %v376_v19  ;;  %237 = vperm.xlu0 %388, %v150_v23   ;;  %p396_p3 = por %p395_p2, %p394_p1 }
  0x11   :  { %378 = vmatprep.subr.bf16.mxu1 %v413_v2 }
  0x12   :  { %p397_p4 = pnand %p396_p3, %p390_p0 }
  0x14   :  { %380 = vmatpush3.bf16.msra.mxu1 %v379_v22 }
  0x8a   :  { %v155_v33 = vpop.permute.xlu0 %154 }
  0x8b   :  { %v161_v40 = vmul.f32 %v160_v37, %v155_v33 }
  0x8f   :  { %v238_v39 = vpop.permute.xlu0 %237 }
  0x90   :  { %v244_v41 = vmul.f32 %v243_v38, %v238_v39 }
  0xdc   :  { %v137_v27 = vpop.f32.mrb[0].mxu0 }
  0xdd   :  { %v138_v28 = vadd.f32 %v320_v26, %v137_v27  ;;  %v346_v29 = vpop.f32.mrb[1].mxu0 }
  0xdf   :  { %v141_v30 = vmax.f32 %v138_v28, 0.0 }
  0xe1   :  { %364 = vmatmul.mubr.msk.f32.vlgmr.msra.gmra.mrb[0].mxu1 %vm162_vm2, %v141_v30 }
 0x1b4   :  { %v232_v42 = vpop.f32.mrb[0].mxu1 }
 0x1b5   :  { %v233_v43 = vadd.f32 %v232_v42, %v161_v40  ;;  %v365_v44 = vpop.f32.mrb[1].mxu1 }
 0x1b7   :  { %v245_v46 = vadd.f32 %v244_v41, %v233_v43 }
 0x1b9   :  { %v253_v47 = vadd.f32 %v323_v45, %v245_v46 }
 0x1bb   :  { %v254_v49 = vmax.f32 %v253_v47, 0.0 }
 0x1bd   :  { %v262_v50 = vmul.f32 %v324_v48, %v254_v49 }
 0x1bf   :  { %v264_v51 = vsel %vm263_vm3, %v262_v50, 0.0 }
 0x1c0   :  { %265 = vadd.xlane.f32.xlu1 %v264_v51 }
 0x24d   :  { %v266_v53 = vpop.xlane.xlu1 %265 }
 0x24e   :  { %v269_v54 = vadd.f32 %v268_v52, %v266_v53 }
 0x250   :  { %270 = vxpose.xlu1.b32.start.end [1/1] (short) (narrow) %v269_v54, 8 }
 0x2d0   :  { %v286_v55 = vpop.trf.xlu1 }
 0x2d1   :  { %303 = vst.msk [vmem:[#allocation3] sm:$0x1] %vm302_vm4, %v286_v55 }
 0x2d2   :  { %400 = shalt.err (!%p397_p4)
}
 0x2d3   :  { %s401_s10 = scalar_lea.hbm %s562_s11, 16 }
 0x2d4   :  { %p402_p5 = scmp.ne.s32.totalorder %s562_s11, %s401_s10  ;;  %p405_p6 = scmp.lt.u32.totalorder %s401_s10, %s562_s11 }
 0x2d6   :  { %p407_p7 = pnand %p405_p6, %p402_p5 }
 0x2d8   :  { %410 = shalt.err (!%p407_p7)
}
 0x2d9   :  { %313 = dma.vmem_to_hbm [thread:$0]  %s311_s8, 16, %s562_s11, [#allocation4]  }
 0x2da   :  { %411 = dma.done.wait [#allocation4], 16  }
 0x2db   :  { %412 = vsyncadd [#allocation4], 4294967280 }
 0x2dc   :  { %317 = vsyncpa [#allocation4], 1 }

</bundles_post_ra>
